<compile_context>
chip_gen: v7x
topology: tpu7x:2x2x1
jax: 0.10.0
libtpu: 0.0.40
codegen_flags: <defaults>
</compile_context>

<pallas_src>
import functools

import jax
import jax.numpy as jnp
from jax.experimental import pallas as pl
from jax.experimental.pallas import tpu as pltpu


def _lane_fold(x):
    """(R, 128*2^m) -> (R, 128) lane-wise partial sums.

    Only 128-aligned 2-D slices + VPU adds; no cross-lane (XLU) work.
    """
    c = x.shape[-1]
    while c > 128:
        half = c // 2
        x = x[:, :half] + x[:, half:]
        c = half
    return x


def _dice_kernel(pred_ref, teach_ref, out_ref, inter_acc, denom_acc,
                 *, smooth, rows, hw, tile_rows, hw_block, fold_lanes):
    i = pl.program_id(0)          # row-tile index (parallel)
    j = pl.program_id(1)          # hw-chunk index (arbitrary, innermost)
    nj = pl.num_programs(1)

    @pl.when(j == 0)
    def _init():
        inter_acc[...] = jnp.zeros_like(inter_acc)
        denom_acc[...] = jnp.zeros_like(denom_acc)

    pred = pred_ref[...].astype(jnp.float32)     # (tile_rows, hw_block)
    teach = teach_ref[...].astype(jnp.float32)   # teacher.float() in torch ref

    # Mask out-of-range columns (static check: only emitted when the last
    # chunk can overhang). (1, hw_block) iota broadcasts over sublanes.
    if hw % hw_block != 0:
        col = jax.lax.broadcasted_iota(jnp.int32, (1, hw_block), 1)
        valid = (j * hw_block + col) < hw
        pred = jnp.where(valid, pred, 0.0)
        teach = jnp.where(valid, teach, 0.0)

    prod = pred * teach          # intersection term
    both = pred + teach          # merged denominator: sum(pred)+sum(teach)

    if fold_lanes:
        # Lane-dense accumulators: pure VPU adds per chunk, unmasked stores.
        inter_acc[...] += _lane_fold(prod)
        denom_acc[...] += _lane_fold(both)
    else:
        inter_acc[...] += jnp.sum(prod, axis=-1, keepdims=True)
        denom_acc[...] += jnp.sum(both, axis=-1, keepdims=True)

    @pl.when(j == nj - 1)
    def _finalize():
        if fold_lanes:
            inter = jnp.sum(inter_acc[...], axis=-1, keepdims=True)
            denom = jnp.sum(denom_acc[...], axis=-1, keepdims=True)
        else:
            inter = inter_acc[...]
            denom = denom_acc[...]
        dice = 1.0 - (2.0 * inter + smooth) / (denom + smooth)
        # Mask rows beyond B*C when the last row tile overhangs (static check).
        # Keep this a select (not a multiply) so garbage NaN/Inf rows cannot leak.
        if rows % tile_rows != 0:
            row = jax.lax.broadcasted_iota(jnp.int32, (tile_rows, 1), 0)
            dice = jnp.where(i * tile_rows + row < rows, dice, 0.0)
        partial = jnp.sum(dice)
        out_ref[...] = jnp.full(out_ref.shape, partial, dtype=out_ref.dtype)


def _sublane_multiple(dtype) -> int:
    return {1: 32, 2: 16}.get(jnp.dtype(dtype).itemsize, 8)


def dice_loss(pred: jax.Array, teacher: jax.Array, smooth: float = 1.0) -> jax.Array:
    assert pred.shape == teacher.shape and pred.ndim == 4
    B, C, H, W = pred.shape
    rows = B * C
    hw = H * W

    if teacher.dtype == jnp.bool_:
        teacher = teacher.astype(jnp.uint8)   # keep mask at 1 byte on the DMA

    # Views only — no padding, no dtype up-cast in the wrapper.
    pred2 = pred.reshape(rows, hw)
    teach2 = teacher.reshape(rows, hw)

    # ---- Dtype-aware block sizing ------------------------------------------
    # VMEM model per block element: double-buffered native-dtype inputs +
    # f32 cast copies (only if input isn't f32) + prod / (pred+teach) temps.
    f32b = 4
    p_bytes = pred2.dtype.itemsize
    t_bytes = teach2.dtype.itemsize
    per_elem = 2 * (p_bytes + t_bytes) + 2 * f32b
    per_elem += 0 if pred2.dtype == jnp.float32 else f32b
    per_elem += 0 if teach2.dtype == jnp.float32 else f32b

    budget = 24 * 1024 * 1024            # working-set budget (limit is 48 MiB)
    block_elems = max(8 * 128, budget // per_elem)

    sub = max(_sublane_multiple(pred2.dtype), _sublane_multiple(teach2.dtype))

    hw_pad = pl.cdiv(hw, 128) * 128
    SMALL_HW = 2048                      # below this, XLU (not HBM) would bind
    fold_lanes = hw <= SMALL_HW
    if fold_lanes:
        # Power-of-two multiple of 128 so the lane fold is a clean halving tree.
        hw_block = 128 * pl.next_power_of_2(pl.cdiv(hw, 128))
    else:
        hw_block = min(hw_pad, max(128, ((block_elems // sub) // 128) * 128))

    rows_pad = pl.cdiv(rows, sub) * sub
    tile_rows = max(sub, ((block_elems // hw_block) // sub) * sub)
    tile_rows = min(tile_rows, rows_pad)
    if rows >= 2 * sub:
        # Guarantee >=2 row tiles so the parallel axis can use both v7x cores.
        tile_rows = min(tile_rows, max(sub, (pl.cdiv(rows, 2) // sub) * sub))

    num_row_tiles = pl.cdiv(rows, tile_rows)
    num_hw_chunks = pl.cdiv(hw, hw_block)
    acc_cols = 128 if fold_lanes else 1

    kernel = functools.partial(
        _dice_kernel, smooth=float(smooth), rows=rows, hw=hw,
        tile_rows=tile_rows, hw_block=hw_block, fold_lanes=fold_lanes)

    partials = pl.pallas_call(
        kernel,
        out_shape=jax.ShapeDtypeStruct((num_row_tiles, 8, 128), jnp.float32),
        grid_spec=pltpu.PrefetchScalarGridSpec(
            num_scalar_prefetch=0,
            grid=(num_row_tiles, num_hw_chunks),
            in_specs=[
                pl.BlockSpec((tile_rows, hw_block), lambda i, j: (i, j)),
                pl.BlockSpec((tile_rows, hw_block), lambda i, j: (i, j)),
            ],
            out_specs=pl.BlockSpec((1, 8, 128), lambda i, j: (i, 0, 0)),
            scratch_shapes=[
                pltpu.VMEM((tile_rows, acc_cols), jnp.float32),  # intersection
                pltpu.VMEM((tile_rows, acc_cols), jnp.float32),  # pred+teacher sum
            ],
        ),
        compiler_params=pltpu.CompilerParams(
            dimension_semantics=("parallel", "arbitrary"),
            vmem_limit_bytes=48 * 1024 * 1024,
        ),
    )(pred2, teach2)

    # mean over C then mean over B == mean over all B*C rows.
    return jnp.sum(partials[:, 0, 0]) / jnp.float32(rows)


def _dice_loss_ref(pred, teacher, smooth=1.0):
    teacher = teacher.astype(jnp.float32)
    inter = jnp.sum(pred * teacher, axis=(-1, -2))
    p = pred.reshape(pred.shape[0], pred.shape[1], -1)
    t = teacher.reshape(teacher.shape[0], teacher.shape[1], -1)
    ps = p.sum(-1)
    ts = t.sum(-1)
    return jnp.mean(1.0 - (2.0 * inter + smooth) / (ps + ts + smooth))


if __name__ == "__main__":
    key = jax.random.PRNGKey(0)
    kp, kt = jax.random.split(key)
    B, C, H, W = 2, 4, 16, 16
    # pred: probabilities in [0,1]; teacher: binary mask (typical usage)
    pred = jax.nn.sigmoid(jax.random.normal(kp, (B, C, H, W), dtype=jnp.float32))
    teacher = (jax.random.uniform(kt, (B, C, H, W)) > 0.5).astype(jnp.float32)

    loss = dice_loss(pred, teacher, smooth=1.0)
    loss = jax.block_until_ready(loss)

    ref = _dice_loss_ref(pred, teacher, smooth=1.0)
    assert jnp.allclose(loss, ref, rtol=1e-5, atol=1e-6), (loss, ref)

    print("KERNEL_OK")
</pallas_src>

<mosaic_0001>
module attributes {stable_mosaic.version = 11 : i64} {
  func.func @_dice_kernel(%arg0: i32, %arg1: i32, %arg2: memref<8x256xf32, #tpu.memory_space<vmem>>, %arg3: memref<8x256xf32, #tpu.memory_space<vmem>>, %arg4: memref<1x8x128xf32, #tpu.memory_space<vmem>>, %arg5: memref<8x128xf32, #tpu.memory_space<vmem>>, %arg6: memref<8x128xf32, #tpu.memory_space<vmem>>) attributes {dimension_semantics = [#tpu.dimension_semantics<parallel>, #tpu.dimension_semantics<arbitrary>], iteration_bounds = array<i64: 1, 1>, scalar_prefetch = 0 : i64, scratch_operands = 2 : i64, tpu.core_type = #tpu.core_type<tc>, window_params = [{transform_indices = @transform_0, window_bounds = array<i64: 8, 256>}, {transform_indices = @transform_1, window_bounds = array<i64: 8, 256>}, {transform_indices = @transform_2, window_bounds = array<i64: 1, 8, 128>}]} {
    %c0_i32 = arith.constant 0 : i32
    %0 = arith.cmpi eq, %arg1, %c0_i32 : i32
    %1 = arith.extui %0 : i1 to i32
    %c0_i32_0 = arith.constant 0 : i32
    %2 = arith.cmpi ne, %1, %c0_i32_0 : i32
    scf.if %2 {
      %cst = arith.constant 0.000000e+00 : f32
      %22 = vector.broadcast %cst : f32 to vector<8x128xf32>
      %c0_14 = arith.constant 0 : index
      %c0_15 = arith.constant 0 : index
      %23 = vector.load %arg5[%c0_14, %c0_15] : memref<8x128xf32, #tpu.memory_space<vmem>>, vector<8x128xf32>
      tpu.vector_store %arg5[%c0_14, %c0_15], %22 {strides = array<i32>} : memref<8x128xf32, #tpu.memory_space<vmem>>, vector<8x128xf32>,
      %cst_16 = arith.constant 0.000000e+00 : f32
      %24 = vector.broadcast %cst_16 : f32 to vector<8x128xf32>
      %c0_17 = arith.constant 0 : index
      %c0_18 = arith.constant 0 : index
      %25 = vector.load %arg6[%c0_17, %c0_18] : memref<8x128xf32, #tpu.memory_space<vmem>>, vector<8x128xf32>
      tpu.vector_store %arg6[%c0_17, %c0_18], %24 {strides = array<i32>} : memref<8x128xf32, #tpu.memory_space<vmem>>, vector<8x128xf32>,
    } else {
    }
    %c0 = arith.constant 0 : index
    %c0_1 = arith.constant 0 : index
    %3 = vector.load %arg2[%c0, %c0_1] : memref<8x256xf32, #tpu.memory_space<vmem>>, vector<8x256xf32>
    %c0_2 = arith.constant 0 : index
    %c0_3 = arith.constant 0 : index
    %4 = vector.load %arg3[%c0_2, %c0_3] : memref<8x256xf32, #tpu.memory_space<vmem>>, vector<8x256xf32>
    %5 = arith.mulf %3, %4 : vector<8x256xf32>
    %6 = arith.addf %3, %4 : vector<8x256xf32>
    %c0_4 = arith.constant 0 : index
    %c0_5 = arith.constant 0 : index
    %7 = vector.load %arg5[%c0_4, %c0_5] : memref<8x128xf32, #tpu.memory_space<vmem>>, vector<8x128xf32>
    %8 = vector.extract_strided_slice %5 {offsets = [0, 0], sizes = [8, 128], strides = [1, 1]} : vector<8x256xf32> to vector<8x128xf32>
    %9 = vector.extract_strided_slice %5 {offsets = [0, 128], sizes = [8, 128], strides = [1, 1]} : vector<8x256xf32> to vector<8x128xf32>
    %10 = arith.addf %8, %9 : vector<8x128xf32>
    %11 = arith.addf %7, %10 : vector<8x128xf32>
    %c0_6 = arith.constant 0 : index
    %c0_7 = arith.constant 0 : index
    %12 = vector.load %arg5[%c0_6, %c0_7] : memref<8x128xf32, #tpu.memory_space<vmem>>, vector<8x128xf32>
    tpu.vector_store %arg5[%c0_6, %c0_7], %11 {strides = array<i32>} : memref<8x128xf32, #tpu.memory_space<vmem>>, vector<8x128xf32>,
    %c0_8 = arith.constant 0 : index
    %c0_9 = arith.constant 0 : index
    %13 = vector.load %arg6[%c0_8, %c0_9] : memref<8x128xf32, #tpu.memory_space<vmem>>, vector<8x128xf32>
    %14 = vector.extract_strided_slice %6 {offsets = [0, 0], sizes = [8, 128], strides = [1, 1]} : vector<8x256xf32> to vector<8x128xf32>
    %15 = vector.extract_strided_slice %6 {offsets = [0, 128], sizes = [8, 128], strides = [1, 1]} : vector<8x256xf32> to vector<8x128xf32>
    %16 = arith.addf %14, %15 : vector<8x128xf32>
    %17 = arith.addf %13, %16 : vector<8x128xf32>
    %c0_10 = arith.constant 0 : index
    %c0_11 = arith.constant 0 : index
    %18 = vector.load %arg6[%c0_10, %c0_11] : memref<8x128xf32, #tpu.memory_space<vmem>>, vector<8x128xf32>
    tpu.vector_store %arg6[%c0_10, %c0_11], %17 {strides = array<i32>} : memref<8x128xf32, #tpu.memory_space<vmem>>, vector<8x128xf32>,
    %c0_i32_12 = arith.constant 0 : i32
    %19 = arith.cmpi eq, %arg1, %c0_i32_12 : i32
    %20 = arith.extui %19 : i1 to i32
    %c0_i32_13 = arith.constant 0 : i32
    %21 = arith.cmpi ne, %20, %c0_i32_13 : i32
    scf.if %21 {
      %c0_14 = arith.constant 0 : index
      %c0_15 = arith.constant 0 : index
      %22 = vector.load %arg5[%c0_14, %c0_15] : memref<8x128xf32, #tpu.memory_space<vmem>>, vector<8x128xf32>
      %cst = arith.constant dense<0.000000e+00> : vector<8xf32>
      %23 = vector.multi_reduction <add>, %22, %cst [1] : vector<8x128xf32> to vector<8xf32>
      %24 = vector.shape_cast %23 : vector<8xf32> to vector<8x1xf32>
      %c0_16 = arith.constant 0 : index
      %c0_17 = arith.constant 0 : index
      %25 = vector.load %arg6[%c0_16, %c0_17] : memref<8x128xf32, #tpu.memory_space<vmem>>, vector<8x128xf32>
      %cst_18 = arith.constant dense<0.000000e+00> : vector<8xf32>
      %26 = vector.multi_reduction <add>, %25, %cst_18 [1] : vector<8x128xf32> to vector<8xf32>
      %27 = vector.shape_cast %26 : vector<8xf32> to vector<8x1xf32>
      %cst_19 = arith.constant 2.000000e+00 : f32
      %28 = vector.broadcast %cst_19 : f32 to vector<8x1xf32>
      %29 = arith.mulf %28, %24 : vector<8x1xf32>
      %cst_20 = arith.constant 1.000000e+00 : f32
      %30 = vector.broadcast %cst_20 : f32 to vector<8x1xf32>
      %31 = arith.addf %29, %30 : vector<8x1xf32>
      %cst_21 = arith.constant 1.000000e+00 : f32
      %32 = vector.broadcast %cst_21 : f32 to vector<8x1xf32>
      %33 = arith.addf %27, %32 : vector<8x1xf32>
      %34 = arith.divf %31, %33 : vector<8x1xf32>
      %cst_22 = arith.constant 1.000000e+00 : f32
      %35 = vector.broadcast %cst_22 : f32 to vector<8x1xf32>
      %36 = arith.subf %35, %34 : vector<8x1xf32>
      %37 = vector.shape_cast %36 : vector<8x1xf32> to vector<1x8x1xf32>
      %cst_23 = arith.constant dense<0.000000e+00> : vector<1xf32>
      %38 = vector.multi_reduction <add>, %37, %cst_23 [1, 2] : vector<1x8x1xf32> to vector<1xf32>
      %39 = vector.shape_cast %38 : vector<1xf32> to vector<1x1x1xf32>
      %40 = vector.extract %39[0, 0, 0] : f32 from vector<1x1x1xf32>
      %41 = vector.broadcast %40 : f32 to vector<1x8x128xf32>
      %c0_24 = arith.constant 0 : index
      %c0_25 = arith.constant 0 : index
      %c0_26 = arith.constant 0 : index
      %42 = vector.load %arg4[%c0_24, %c0_25, %c0_26] : memref<1x8x128xf32, #tpu.memory_space<vmem>>, vector<1x8x128xf32>
      tpu.vector_store %arg4[%c0_24, %c0_25, %c0_26], %41 {strides = array<i32>} : memref<1x8x128xf32, #tpu.memory_space<vmem>>, vector<1x8x128xf32>,
    } else {
    }
    return
  }
  func.func @transform_0(%arg0: i32, %arg1: i32) -> (i32, i32) {
    %c0_i32 = arith.constant 0 : i32
    return %arg0, %arg1 : i32, i32
  }
  func.func @transform_1(%arg0: i32, %arg1: i32) -> (i32, i32) {
    %c0_i32 = arith.constant 0 : i32
    return %arg0, %arg1 : i32, i32
  }
  func.func @transform_2(%arg0: i32, %arg1: i32) -> (i32, i32, i32) {
    %c0_i32 = arith.constant 0 : i32
    %c0_i32_0 = arith.constant 0 : i32
    %c0_i32_1 = arith.constant 0 : i32
    return %arg0, %c0_i32, %c0_i32_0 : i32, i32, i32
  }
}

</mosaic_0001>

<bundles_post_ra>
// kernel: tpu_custom_call.1
= control target key start
LH: loop header
LB: loop body
LE: loop exit
PB: predicated region body
PF: predicated region fallthrough
CT: control target
= control target key end

     0   :  { %7 = vsyncpa [#allocation5], 0  ;;  %s235_s0 = inlined_call_operand.hbm [shape: f32[8,256], index: 0, kind: input, shape index: {}]   ;;  %s236_s1 = inlined_call_operand.hbm [shape: f32[8,256], index: 1, kind: input, shape index: {}]   ;;  %s237_s2 = inlined_call_operand.hbm [shape: f32[1,8,128], index: 2, kind: output, shape index: {}]  }
   0x1   :  { %8 = vsyncpa [#allocation8], 0 }
   0x2   :  { %9 = vsyncpa [#allocation6], 0  ;;  %s181_s9 = smov [#allocation4]   ;;  %s182_s11 = smov [#allocation7]  }
   0x3   :  { %s16_s10 = sshll.u32 %s181_s9, 4  ;;  %s26_s12 = sshll.u32 %s182_s11, 4  ;;  %s17_s10 = int_to_ptr.vmem [resolvable:$true] %s16_s10  ;;  %s27_s12 = int_to_ptr.vmem [resolvable:$true] %s26_s12 }
   0x4   :  { %s109_s15 = scalar_lea.hbm %s235_s0, 256 }
   0x5   :  { %p110_p0 = scmp.ne.s32.totalorder %s235_s0, %s109_s15  ;;  %p113_p1 = scmp.lt.u32.totalorder %s109_s15, %s235_s0 }
   0x7   :  { %p115_p2 = pnand %p113_p1, %p110_p0 }
   0x9   :  { %118 = shalt.err (!%p115_p2)
}
   0xa   :  { %s119_s20 = scalar_lea.vmem %s17_s10, 256  ;;  %p124_p4 = scmp.lt.s32.totalorder %s17_s10, %s17_s10 }
   0xb   :  { %p120_p3 = scmp.ne.s32.totalorder %s17_s10, %s119_s20  ;;  %p125_p5 = scmp.lt.s32.totalorder %s119_s20, %s119_s20 }
   0xd   :  { %p126_p6 = por %p125_p5, %p124_p4 }
   0xf   :  { %p127_p7 = pnand %p126_p6, %p120_p3 }
  0x11   :  { %130 = shalt.err (!%p127_p7)
}
  0x12   :  { %19 = dma.hbm_to_vmem [thread:$0]  %s235_s0, 256, %s17_s10, [#allocation5]  }
  0x13   :  { %s131_s25 = scalar_lea.hbm %s236_s1, 256 }
  0x14   :  { %p132_p8 = scmp.ne.s32.totalorder %s236_s1, %s131_s25  ;;  %p135_p9 = scmp.lt.u32.totalorder %s131_s25, %s236_s1 }
  0x16   :  { %p137_p10 = pnand %p135_p9, %p132_p8 }
  0x18   :  { %140 = shalt.err (!%p137_p10)
}
  0x19   :  { %s141_s30 = scalar_lea.vmem %s27_s12, 256  ;;  %p146_p12 = scmp.lt.s32.totalorder %s27_s12, %s27_s12 }
  0x1a   :  { %p142_p11 = scmp.ne.s32.totalorder %s27_s12, %s141_s30  ;;  %p147_p13 = scmp.lt.s32.totalorder %s141_s30, %s141_s30 }
  0x1c   :  { %p148_p0 = por %p147_p13, %p146_p12 }
  0x1e   :  { %p149_p1 = pnand %p148_p0, %p142_p11 }
  0x20   :  { %152 = shalt.err (!%p149_p1)
}
  0x21   :  { %29 = dma.hbm_to_vmem [thread:$0]  %s236_s1, 256, %s27_s12, [#allocation8]  }
  0x22   :  { %175 = dma.done.wait [#allocation5], 256  }
  0x23   :  { %176 = vsyncadd [#allocation5], 4294967040 }
  0x24   :  { %177 = dma.done.wait [#allocation8], 256  }
  0x25   :  { %178 = vsyncadd [#allocation8], 4294967040  ;;  %v42_v0 = vld [vmem:[#allocation4] sm:$0xff]  ;;  %v43_v1 = vld [vmem:[#allocation4 + $0x8] sm:$0xff]  ;;  %vm73_vm0 = vcmask 7168   ;;  %s183_s1 = smov [#allocation9]  }
  0x26   :  { %v44_v2 = vld [vmem:[#allocation7] sm:$0xff]  ;;  %v45_v3 = vld [vmem:[#allocation7 + $0x8] sm:$0xff]  ;;  %s92_s4 = sshll.u32 %s183_s1, 4  ;;  %s93_s4 = int_to_ptr.vmem [resolvable:$true] %s92_s4 }
  0x27   :  { %v48_v4 = vadd.f32 %v44_v2, %v42_v0  ;;  %v49_v5 = vadd.f32 %v45_v3, %v43_v1  ;;  %v46_v6 = vmul.f32 %v44_v2, %v42_v0  ;;  %v47_v7 = vmul.f32 %v45_v3, %v43_v1  ;;  %s153_s6 = scalar_lea.vmem %s93_s4, 128  ;;  %p158_p3 = scmp.lt.s32.totalorder %s93_s4, %s93_s4 }
  0x28   :  { %p154_p2 = scmp.ne.s32.totalorder %s93_s4, %s153_s6  ;;  %p159_p4 = scmp.lt.s32.totalorder %s153_s6, %s153_s6 }
  0x29   :  { %v55_v8 = vadd.f32 %v49_v5, %v48_v4  ;;  %v51_v9 = vadd.f32 %v47_v7, %v46_v6 }
  0x2a   :  { %p160_p5 = por %p159_p4, %p158_p3 }
  0x2b   :  { %65 = vadd.xlane.f32.xlu0 %v55_v8 }
  0x2c   :  { %p161_p6 = pnand %p160_p5, %p154_p2 }
  0x2f   :  { %62 = vadd.xlane.f32.xlu0 %v51_v9 }
  0xb8   :  { %v66_v10 = vpop.xlane.xlu0 %65 }
  0xb9   :  { %v69_v11 = vadd.f32 1.0, %v66_v10 }
  0xbb   :  { %107 = vrcp.f32 %v69_v11 }
  0xbc   :  { %v63_v12 = vpop.xlane.xlu0 %62 }
  0xbd   :  { %v67_v13 = vmul.f32 2.0, %v63_v12 }
  0xbf   :  { %v68_v14 = vadd.f32 1.0, %v67_v13 }
  0xc5   :  { %v108_v15 = vpop.eup %107 }
  0xc6   :  { %v71_v16 = vmul.f32 %v108_v15, %v68_v14 }
  0xc8   :  { %v72_v17 = vsub.f32 1.0, %v71_v16 }
  0xca   :  { %v74_v18 = vsel %vm73_vm0, %v72_v17, 0.0 }
  0xcb   :  { %75 = vadd.xlane.f32.xlu1 %v74_v18 }
 0x158   :  { %v76_v19 = vpop.xlane.xlu1 %75 }
 0x159   :  { %v77_v20 = vrot.slane %v76_v19, 4 }
 0x15b   :  { %v78_v21 = vadd.f32 %v77_v20, %v76_v19 }
 0x15d   :  { %v79_v22 = vrot.slane %v78_v21, 2 }
 0x15f   :  { %v80_v23 = vadd.f32 %v79_v22, %v78_v21 }
 0x161   :  { %v81_v24 = vrot.slane %v80_v23, 1 }
 0x163   :  { %v82_v25 = vadd.f32 %v81_v24, %v80_v23 }
 0x165   :  { %102 = vpush %v82_v25 }
 0x196   :  { %s103_s5 = spop %102 }
 0x197   :  { %v84_v26 = vstv %s103_s5 }
 0x198   :  { %85 = vst [vmem:[#allocation9] sm:$0xff] %v84_v26 }
 0x199   :  { %164 = shalt.err (!%p161_p6)
}
 0x19a   :  { %s165_s9 = scalar_lea.hbm %s237_s2, 128 }
 0x19b   :  { %p166_p7 = scmp.ne.s32.totalorder %s237_s2, %s165_s9  ;;  %p169_p8 = scmp.lt.u32.totalorder %s165_s9, %s237_s2 }
 0x19d   :  { %p171_p9 = pnand %p169_p8, %p166_p7 }
 0x19f   :  { %174 = shalt.err (!%p171_p9)
}
 0x1a0   :  { %95 = dma.vmem_to_hbm [thread:$0]  %s93_s4, 128, %s237_s2, [#allocation6]  }
 0x1a1   :  { %179 = dma.done.wait [#allocation6], 128  }
 0x1a2   :  { %180 = vsyncadd [#allocation6], 4294967168 }
 0x1a3   :  { %99 = vsyncpa [#allocation5], 1 }
 0x1a4   :  { %100 = vsyncpa [#allocation8], 1 }
 0x1a5   :  { %101 = vsyncpa [#allocation6], 1 }

</bundles_post_ra>
